<compile_context>
chip_gen: v7x
topology: tpu7x:2x2x1
jax: 0.10.0
libtpu: 0.0.40
codegen_flags: <defaults>
</compile_context>

<pallas_src>
import functools

import jax
import jax.numpy as jnp
from jax import lax
from jax.experimental import pallas as pl
from jax.experimental.pallas import tpu as pltpu

MARGIN = 1.0
EPS = 1e-6

_MIB = 1024 * 1024
_MAX_TILE_ROWS = 8192      # upper bound on the batch tile (HBM-bound kernel)
_REDUCE_SHARDS = 2         # leading "parallel" axis on the sum/mean path
                           # (2 TCs on v7x; serialized and ~free on 1-TC chips)


def _round_up(x, m):
    return ((x + m - 1) // m) * m


def _vmem_budgets():
    """(tile budget bytes, vmem_limit_bytes) picked per TPU generation."""
    vmem = None
    try:
        info = pltpu.get_tpu_info()
        vmem = getattr(info, "vmem_capacity_bytes", None)
    except Exception:
        vmem = None
    if vmem is None:
        vmem = 64 * _MIB                       # conservative: assume v7x
    if vmem >= 128 * _MIB:                     # v5e / v6e
        return 48 * _MIB, 96 * _MIB
    return 24 * _MIB, 48 * _MIB                # v7x (64 MiB physical per TC)


def _compute_dtype(dtype):
    # bf16 stays bf16 (bf16-native VPU/MXU on v6e/v7x; v5e widens internally,
    # so correctness is unaffected).  Everything else is computed in f32.
    if dtype == jnp.bfloat16 or dtype == jnp.float32:
        return dtype
    return jnp.float32


def _per_sample_losses(a_ref, p_ref, n_ref):
    """Per-sample triplet losses for the current tile, lane-dense (1, TILE_N) f32."""
    a = a_ref[...]
    p = p_ref[...]
    n = n_ref[...]
    cdt = _compute_dtype(a.dtype)
    if a.dtype != cdt:
        a = a.astype(cdt)
        p = p.astype(cdt)
        n = n.astype(cdt)

    d = a.shape[-1]
    eps = jnp.asarray(EPS, cdt)
    diff_ap = a - p + eps            # eps-per-component, matches torch.pairwise_distance
    diff_an = a - n + eps

    # Row-wise sum of squares via an MXU contraction with a ones vector:
    #   (1, D) . (TILE_N, D)^T -> (1, TILE_N)   (f32 accumulate on the MXU)
    # Batch lands on the lane axis (lane-dense result/store) and the cross-lane
    # reduction rides the otherwise idle MXU slot instead of VALU/XLU.
    ones_row = jnp.ones((1, d), cdt)
    dims = (((1,), (1,)), ((), ()))
    sq_ap = lax.dot_general(ones_row, diff_ap * diff_ap, dims,
                            preferred_element_type=jnp.float32)
    sq_an = lax.dot_general(ones_row, diff_an * diff_an, dims,
                            preferred_element_type=jnp.float32)

    d_ap = jnp.sqrt(sq_ap)
    d_an = jnp.sqrt(sq_an)
    return jnp.maximum(d_ap - d_an + MARGIN, 0.0)         # (1, TILE_N) f32


def _triplet_none_kernel(a_ref, p_ref, n_ref, o_ref):
    # Padded rows (if any) produce junk losses that the wrapper slices off.
    o_ref[...] = _per_sample_losses(a_ref, p_ref, n_ref)


def _triplet_reduce_kernel(a_ref, p_ref, n_ref, o_ref, *,
                           tile_n, steps_per_shard, n_valid, needs_mask):
    c = pl.program_id(0)          # shard: owns its own resident output block
    i = pl.program_id(1)          # step within shard (accumulation axis)
    per = _per_sample_losses(a_ref, p_ref, n_ref)         # (1, tile_n) f32

    if needs_mask:                                         # static: only when padded
        blk = c * steps_per_shard + i
        lane = lax.broadcasted_iota(jnp.int32, (1, tile_n), 1)
        valid = (blk * tile_n + lane) < n_valid
        per = jnp.where(valid, per, 0.0)

    partial = jnp.sum(per, axis=-1, keepdims=True)         # (1, 1) f32

    # Place the partial at element [0, 0] of an (8, 128) vreg-sized block and
    # add it into this shard's resident accumulator; the wrapper sums the
    # (zero elsewhere) per-shard blocks.
    row = lax.broadcasted_iota(jnp.int32, (8, 128), 0)
    col = lax.broadcasted_iota(jnp.int32, (8, 128), 1)
    partial_block = jnp.where((row == 0) & (col == 0), partial, 0.0)

    @pl.when(i == 0)
    def _init():
        o_ref[...] = jnp.zeros_like(o_ref)

    o_ref[...] += partial_block


def triplet_loss(anchors, positives, negatives, reduction="mean",
                 max_rows_per_block=None):
    assert anchors.shape == positives.shape == negatives.shape
    assert anchors.ndim == 2
    assert reduction in ("mean", "sum", "none")
    n, d = anchors.shape
    in_dtype = anchors.dtype
    itemsize = jnp.dtype(in_dtype).itemsize
    c_itemsize = jnp.dtype(_compute_dtype(in_dtype)).itemsize
    sublane = {4: 8, 2: 16, 1: 32}.get(itemsize, 8)

    budget, vmem_limit = _vmem_budgets()

    # Batch tile: as many rows as the budget allows, counting the 3 x 2
    # double-buffered input blocks AND the materialized compute temporaries
    # (diffs / squared diffs in the compute dtype).  Multiple of 128 whenever
    # the grid has more than one step so blocks stay (8, 128)-legal.
    bytes_per_row = 6 * d * itemsize + 6 * d * c_itemsize
    cap = budget // bytes_per_row
    cap = min(_MAX_TILE_ROWS, max(128, (cap // 128) * 128))
    if max_rows_per_block is not None:                     # test / tuning hook
        cap = max(128, min(cap, (max_rows_per_block // 128) * 128))
    # TODO(synk): for extremely large D (where even 128 rows exceed the budget)
    # the feature axis should be tiled too; unnecessary at realistic embedding sizes.

    n_rounded = _round_up(n, sublane)
    tile_n = n_rounded if n_rounded <= cap else cap
    num_blocks = -(-n // tile_n)

    if reduction == "none":
        n_pad = num_blocks * tile_n
    else:
        num_shards = _REDUCE_SHARDS if num_blocks >= _REDUCE_SHARDS else 1
        steps_per_shard = -(-num_blocks // num_shards)
        num_blocks = num_shards * steps_per_shard
        n_pad = num_blocks * tile_n

    if n_pad != n:
        pad = ((0, n_pad - n), (0, 0))
        anchors = jnp.pad(anchors, pad)
        positives = jnp.pad(positives, pad)
        negatives = jnp.pad(negatives, pad)

    in_bytes = 3 * n * d * itemsize

    if reduction == "none":
        cost = pl.CostEstimate(flops=10 * n * d, transcendentals=2 * n,
                               bytes_accessed=in_bytes + 4 * n_pad)
        out = pl.pallas_call(
            _triplet_none_kernel,
            grid=(num_blocks,),
            in_specs=[pl.BlockSpec((tile_n, d), lambda i: (i, 0))] * 3,
            out_specs=pl.BlockSpec((1, tile_n), lambda i: (0, i)),
            out_shape=jax.ShapeDtypeStruct((1, n_pad), jnp.float32),
            compiler_params=pltpu.CompilerParams(
                dimension_semantics=("parallel",),        # independent tiles
                vmem_limit_bytes=vmem_limit),
            cost_estimate=cost,
        )(anchors, positives, negatives)
        return out[0, :n].astype(in_dtype)                # PyTorch returns input dtype

    # 'sum' / 'mean': per-shard resident accumulators on a "parallel" leading
    # axis (both TCs on v7x); combine + normalize in the wrapper.
    kernel = functools.partial(
        _triplet_reduce_kernel, tile_n=tile_n, steps_per_shard=steps_per_shard,
        n_valid=n, needs_mask=(n_pad != n))
    cost = pl.CostEstimate(flops=10 * n * d, transcendentals=2 * n,
                           bytes_accessed=in_bytes + 4 * num_shards * 8 * 128)
    out = pl.pallas_call(
        kernel,
        grid=(num_shards, steps_per_shard),
        in_specs=[pl.BlockSpec(
            (tile_n, d), lambda c, i: (c * steps_per_shard + i, 0))] * 3,
        out_specs=pl.BlockSpec((8, 128), lambda c, i: (c, 0)),
        out_shape=jax.ShapeDtypeStruct((num_shards * 8, 128), jnp.float32),
        compiler_params=pltpu.CompilerParams(
            dimension_semantics=("parallel", "arbitrary"),
            vmem_limit_bytes=vmem_limit),
        cost_estimate=cost,
    )(anchors, positives, negatives)

    total = jnp.sum(out)                                   # few per-shard partials
    if reduction == "mean":
        total = total / float(n)
    return total.astype(in_dtype)


def _reference(anchors, positives, negatives, reduction="mean"):
    a = anchors.astype(jnp.float32)
    p = positives.astype(jnp.float32)
    n = negatives.astype(jnp.float32)
    d_ap = jnp.sqrt(jnp.sum((a - p + EPS) ** 2, axis=-1))
    d_an = jnp.sqrt(jnp.sum((a - n + EPS) ** 2, axis=-1))
    per = jnp.maximum(d_ap - d_an + MARGIN, 0.0)
    if reduction == "none":
        return per
    if reduction == "sum":
        return jnp.sum(per)
    return jnp.mean(per)


if __name__ == "__main__":
    key = jax.random.PRNGKey(0)
    ok = True
    cases = (
        # (N, D, max_rows_per_block):
        #   (8, 32, None)    exact-fit single block
        #   (10, 32, None)   row padding + reduce-path masking
        #   (300, 32, 128)   forced multi-block grid: exercises the 2-shard
        #                    parallel reduce path and the multi-tile 'none' path
        (8, 32, None),
        (10, 32, None),
        (300, 32, 128),
    )
    for (N, D, max_rows) in cases:
        k_a, k_p, k_n = jax.random.split(jax.random.fold_in(key, N), 3)
        anchors = jax.random.normal(k_a, (N, D), dtype=jnp.float32)
        positives = jax.random.normal(k_p, (N, D), dtype=jnp.float32)
        negatives = jax.random.normal(k_n, (N, D), dtype=jnp.float32)
        for reduction in ("mean", "sum", "none"):
            out = jax.block_until_ready(
                triplet_loss(anchors, positives, negatives, reduction=reduction,
                             max_rows_per_block=max_rows))
            ref = _reference(anchors, positives, negatives, reduction=reduction)
            if not jnp.allclose(out, ref, atol=1e-4, rtol=1e-4):
                ok = False

    if ok:
        print("KERNEL_OK")
</pallas_src>

<mosaic_0001>
module attributes {stable_mosaic.version = 11 : i64} {
  func.func @_triplet_reduce_kernel(%arg0: i32, %arg1: i32, %arg2: memref<8x32xf32, #tpu.memory_space<vmem>>, %arg3: memref<8x32xf32, #tpu.memory_space<vmem>>, %arg4: memref<8x32xf32, #tpu.memory_space<vmem>>, %arg5: memref<8x128xf32, #tpu.memory_space<vmem>>) attributes {dimension_semantics = [#tpu.dimension_semantics<parallel>, #tpu.dimension_semantics<arbitrary>], iteration_bounds = array<i64: 1, 1>, scalar_prefetch = 0 : i64, scratch_operands = 0 : i64, tpu.core_type = #tpu.core_type<tc>, window_params = [{transform_indices = @transform_0, window_bounds = array<i64: 8, 32>}, {transform_indices = @transform_1, window_bounds = array<i64: 8, 32>}, {transform_indices = @transform_2, window_bounds = array<i64: 8, 32>}, {transform_indices = @transform_3, window_bounds = array<i64: 8, 128>}]} {
    %c0 = arith.constant 0 : index
    %c0_0 = arith.constant 0 : index
    %0 = vector.load %arg2[%c0, %c0_0] : memref<8x32xf32, #tpu.memory_space<vmem>>, vector<8x32xf32>
    %c0_1 = arith.constant 0 : index
    %c0_2 = arith.constant 0 : index
    %1 = vector.load %arg3[%c0_1, %c0_2] : memref<8x32xf32, #tpu.memory_space<vmem>>, vector<8x32xf32>
    %c0_3 = arith.constant 0 : index
    %c0_4 = arith.constant 0 : index
    %2 = vector.load %arg4[%c0_3, %c0_4] : memref<8x32xf32, #tpu.memory_space<vmem>>, vector<8x32xf32>
    %3 = arith.subf %0, %1 : vector<8x32xf32>
    %cst = arith.constant 9.99999997E-7 : f32
    %4 = vector.broadcast %cst : f32 to vector<8x32xf32>
    %5 = arith.addf %3, %4 : vector<8x32xf32>
    %6 = arith.subf %0, %2 : vector<8x32xf32>
    %cst_5 = arith.constant 9.99999997E-7 : f32
    %7 = vector.broadcast %cst_5 : f32 to vector<8x32xf32>
    %8 = arith.addf %6, %7 : vector<8x32xf32>
    %cst_6 = arith.constant 1.000000e+00 : f32
    %9 = vector.broadcast %cst_6 : f32 to vector<1x32xf32>
    %10 = arith.mulf %5, %5 : vector<8x32xf32>
    %cst_7 = arith.constant dense<0.000000e+00> : vector<1x8xf32>
    %11 = tpu.matmul %9, %10, %cst_7 {dimension_numbers = #tpu.dot_dimension_numbers<[1], [1], [0], [0], [0, 0, 1, 0], [], []>} : vector<1x32xf32>, vector<8x32xf32>, vector<1x8xf32> -> vector<1x8xf32>
    %12 = arith.mulf %8, %8 : vector<8x32xf32>
    %cst_8 = arith.constant dense<0.000000e+00> : vector<1x8xf32>
    %13 = tpu.matmul %9, %12, %cst_8 {dimension_numbers = #tpu.dot_dimension_numbers<[1], [1], [0], [0], [0, 0, 1, 0], [], []>} : vector<1x32xf32>, vector<8x32xf32>, vector<1x8xf32> -> vector<1x8xf32>
    %14 = math.sqrt %11 : vector<1x8xf32>
    %15 = math.sqrt %13 : vector<1x8xf32>
    %16 = arith.subf %14, %15 : vector<1x8xf32>
    %cst_9 = arith.constant 1.000000e+00 : f32
    %17 = vector.broadcast %cst_9 : f32 to vector<1x8xf32>
    %18 = arith.addf %16, %17 : vector<1x8xf32>
    %cst_10 = arith.constant 0.000000e+00 : f32
    %19 = vector.broadcast %cst_10 : f32 to vector<1x8xf32>
    %20 = arith.maximumf %18, %19 : vector<1x8xf32>
    %cst_11 = arith.constant dense<0.000000e+00> : vector<1xf32>
    %21 = vector.multi_reduction <add>, %20, %cst_11 [1] : vector<1x8xf32> to vector<1xf32>
    %22 = vector.shape_cast %21 : vector<1xf32> to vector<1x1xf32>
    %23 = tpu.iota {dimensions = array<i32: 0>} : vector<8x128xi32>
    %24 = tpu.iota {dimensions = array<i32: 1>} : vector<8x128xi32>
    %c0_i32 = arith.constant 0 : i32
    %25 = vector.broadcast %c0_i32 : i32 to vector<8x128xi32>
    %26 = arith.cmpi eq, %23, %25 : vector<8x128xi32>
    %c0_i32_12 = arith.constant 0 : i32
    %27 = vector.broadcast %c0_i32_12 : i32 to vector<8x128xi32>
    %28 = arith.cmpi eq, %24, %27 : vector<8x128xi32>
    %29 = arith.andi %26, %28 : vector<8x128xi1>
    %cst_13 = arith.constant 0.000000e+00 : f32
    %30 = vector.shape_cast %22 : vector<1x1xf32> to vector<1x1xf32>
    %31 = vector.broadcast %30 : vector<1x1xf32> to vector<8x128xf32>
    %32 = vector.broadcast %cst_13 : f32 to vector<8x128xf32>
    %33 = arith.select %29, %31, %32 : vector<8x128xi1>, vector<8x128xf32>
    %c0_i32_14 = arith.constant 0 : i32
    %34 = arith.cmpi eq, %arg1, %c0_i32_14 : i32
    %35 = arith.extui %34 : i1 to i32
    %c0_i32_15 = arith.constant 0 : i32
    %36 = arith.cmpi ne, %35, %c0_i32_15 : i32
    scf.if %36 {
      %cst_20 = arith.constant 0.000000e+00 : f32
      %40 = vector.broadcast %cst_20 : f32 to vector<8x128xf32>
      %c0_21 = arith.constant 0 : index
      %c0_22 = arith.constant 0 : index
      %41 = vector.load %arg5[%c0_21, %c0_22] : memref<8x128xf32, #tpu.memory_space<vmem>>, vector<8x128xf32>
      tpu.vector_store %arg5[%c0_21, %c0_22], %40 {strides = array<i32>} : memref<8x128xf32, #tpu.memory_space<vmem>>, vector<8x128xf32>,
    } else {
    }
    %c0_16 = arith.constant 0 : index
    %c0_17 = arith.constant 0 : index
    %37 = vector.load %arg5[%c0_16, %c0_17] : memref<8x128xf32, #tpu.memory_space<vmem>>, vector<8x128xf32>
    %38 = arith.addf %37, %33 : vector<8x128xf32>
    %c0_18 = arith.constant 0 : index
    %c0_19 = arith.constant 0 : index
    %39 = vector.load %arg5[%c0_18, %c0_19] : memref<8x128xf32, #tpu.memory_space<vmem>>, vector<8x128xf32>
    tpu.vector_store %arg5[%c0_18, %c0_19], %38 {strides = array<i32>} : memref<8x128xf32, #tpu.memory_space<vmem>>, vector<8x128xf32>,
    return
  }
  func.func @transform_0(%arg0: i32, %arg1: i32) -> (i32, i32) {
    %c1_i32 = arith.constant 1 : i32
    %0 = arith.muli %arg0, %c1_i32 : i32
    %1 = arith.addi %0, %arg1 : i32
    %c0_i32 = arith.constant 0 : i32
    %c0_i32_0 = arith.constant 0 : i32
    return %1, %c0_i32 : i32, i32
  }
  func.func @transform_1(%arg0: i32, %arg1: i32) -> (i32, i32) {
    %c1_i32 = arith.constant 1 : i32
    %0 = arith.muli %arg0, %c1_i32 : i32
    %1 = arith.addi %0, %arg1 : i32
    %c0_i32 = arith.constant 0 : i32
    %c0_i32_0 = arith.constant 0 : i32
    return %1, %c0_i32 : i32, i32
  }
  func.func @transform_2(%arg0: i32, %arg1: i32) -> (i32, i32) {
    %c1_i32 = arith.constant 1 : i32
    %0 = arith.muli %arg0, %c1_i32 : i32
    %1 = arith.addi %0, %arg1 : i32
    %c0_i32 = arith.constant 0 : i32
    %c0_i32_0 = arith.constant 0 : i32
    return %1, %c0_i32 : i32, i32
  }
  func.func @transform_3(%arg0: i32, %arg1: i32) -> (i32, i32) {
    %c0_i32 = arith.constant 0 : i32
    %c0_i32_0 = arith.constant 0 : i32
    return %arg0, %c0_i32 : i32, i32
  }
}

</mosaic_0001>

<bundles_post_ra>
// kernel: tpu_custom_call.1
= control target key start
LH: loop header
LB: loop body
LE: loop exit
PB: predicated region body
PF: predicated region fallthrough
CT: control target
= control target key end

     0   :  { %8 = vsyncpa [#allocation3], 0  ;;  %s476_s0 = inlined_call_operand.hbm [shape: f32[8,32], index: 0, kind: input, shape index: {}]   ;;  %s477_s1 = inlined_call_operand.hbm [shape: f32[8,32], index: 1, kind: input, shape index: {}]   ;;  %s478_s2 = inlined_call_operand.hbm [shape: f32[8,32], index: 2, kind: input, shape index: {}]   ;;  %s479_s3 = inlined_call_operand.hbm [shape: f32[8,128], index: 3, kind: output, shape index: {}]  }
   0x1   :  { %9 = vsyncpa [#allocation6], 0 }
   0x2   :  { %10 = vsyncpa [#allocation4], 0  ;;  %s401_s12 = smov [#allocation5]   ;;  %s402_s14 = smov [#allocation2]  }
   0x3   :  { %s33_s13 = sshll.u32 %s401_s12, 4  ;;  %s20_s15 = sshll.u32 %s402_s14, 4  ;;  %s34_s13 = int_to_ptr.vmem [resolvable:$true] %s33_s13  ;;  %s21_s15 = int_to_ptr.vmem [resolvable:$true] %s20_s15 }
   0x4   :  { %s307_s18 = scalar_lea.hbm %s477_s1, 128 }
   0x5   :  { %p308_p0 = scmp.ne.s32.totalorder %s477_s1, %s307_s18  ;;  %p311_p1 = scmp.lt.u32.totalorder %s307_s18, %s477_s1 }
   0x7   :  { %p313_p2 = pnand %p311_p1, %p308_p0 }
   0x9   :  { %316 = shalt.err (!%p313_p2)
}
   0xa   :  { %s317_s23 = scalar_lea.vmem %s34_s13, 128  ;;  %p322_p4 = scmp.lt.s32.totalorder %s34_s13, %s34_s13 }
   0xb   :  { %p318_p3 = scmp.ne.s32.totalorder %s34_s13, %s317_s23  ;;  %p323_p5 = scmp.lt.s32.totalorder %s317_s23, %s317_s23 }
   0xd   :  { %p324_p6 = por %p323_p5, %p322_p4 }
   0xf   :  { %p325_p7 = pnand %p324_p6, %p318_p3 }
  0x11   :  { %328 = shalt.err (!%p325_p7)
}
  0x12   :  { %36 = dma.hbm_to_vmem [thread:$0]  %s477_s1, 128, %s34_s13, [#allocation6]  }
  0x13   :  { %s329_s28 = scalar_lea.hbm %s476_s0, 128 }
  0x14   :  { %p330_p8 = scmp.ne.s32.totalorder %s476_s0, %s329_s28  ;;  %p333_p9 = scmp.lt.u32.totalorder %s329_s28, %s476_s0 }
  0x16   :  { %p335_p10 = pnand %p333_p9, %p330_p8 }
  0x18   :  { %338 = shalt.err (!%p335_p10)
}
  0x19   :  { %s339_s6 = scalar_lea.vmem %s21_s15, 128  ;;  %p344_p12 = scmp.lt.s32.totalorder %s21_s15, %s21_s15 }
  0x1a   :  { %p340_p11 = scmp.ne.s32.totalorder %s21_s15, %s339_s6  ;;  %p345_p13 = scmp.lt.s32.totalorder %s339_s6, %s339_s6 }
  0x1c   :  { %p346_p0 = por %p345_p13, %p344_p12 }
  0x1e   :  { %p347_p1 = pnand %p346_p0, %p340_p11 }
  0x20   :  { %350 = shalt.err (!%p347_p1)
}
  0x21   :  { %23 = dma.hbm_to_vmem [thread:$0]  %s476_s0, 128, %s21_s15, [#allocation3]  }
  0x22   :  { %s403_s8 = smov [#allocation7]   ;;  %s351_s12 = scalar_lea.hbm %s478_s2, 128 }
  0x23   :  { %s46_s9 = sshll.u32 %s403_s8, 4  ;;  %p352_p2 = scmp.ne.s32.totalorder %s478_s2, %s351_s12  ;;  %s47_s9 = int_to_ptr.vmem [resolvable:$true] %s46_s9 }
  0x24   :  { %p355_p3 = scmp.lt.u32.totalorder %s351_s12, %s478_s2 }
  0x26   :  { %p357_p4 = pnand %p355_p3, %p352_p2 }
  0x28   :  { %360 = shalt.err (!%p357_p4)
}
  0x29   :  { %s361_s18 = scalar_lea.vmem %s47_s9, 128  ;;  %p366_p6 = scmp.lt.s32.totalorder %s47_s9, %s47_s9 }
  0x2a   :  { %p362_p5 = scmp.ne.s32.totalorder %s47_s9, %s361_s18  ;;  %p367_p7 = scmp.lt.s32.totalorder %s361_s18, %s361_s18 }
  0x2c   :  { %p368_p8 = por %p367_p7, %p366_p6 }
  0x2e   :  { %p369_p9 = pnand %p368_p8, %p362_p5 }
  0x30   :  { %372 = shalt.err (!%p369_p9)
}
  0x31   :  { %49 = dma.hbm_to_vmem [thread:$0]  %s478_s2, 128, %s47_s9, [#allocation6]  }
  0x32   :  { %395 = dma.done.wait [#allocation3], 128  }
  0x33   :  { %396 = vsyncadd [#allocation3], 4294967168 }
  0x34   :  { %397 = dma.done.wait [#allocation6], 256  }
  0x35   :  { %398 = vsyncadd [#allocation6], 4294967040  ;;  %v404_v0 = vmov 0.0   ;;  %vm405_vm0 = vmmov 0   ;;  %v62_v1 = vld [vmem:[#allocation2] sm:$0xff]  ;;  %v63_v2 = vld [vmem:[#allocation5] sm:$0xff]  ;;  %v242_v29 = vlaneseq }
  0x36   :  { %286 = vmatprep.subr.mxu0 %v404_v0  ;;  %291 = vmatprep.subr.mxu1 %v404_v0  ;;  %v64_v3 = vld [vmem:[#allocation7] sm:$0xff]  ;;  %v65_v4 = vsub.f32 %v62_v1, %v63_v2  ;;  %vm70_vm1 = vcmask 261120   ;;  %v406_v10 = vmov 1.0   ;;  %vm238_vm6 = vcmask 57344   ;;  %s407_s2 = smov [#allocation8]  }
  0x37   :  { %288 = vmatprep.mubr.msk.f32.mxu0 %vm405_vm0, %v404_v0  ;;  %293 = vmatprep.mubr.msk.f32.mxu1 %vm405_vm0, %v404_v0  ;;  %v67_v5 = vsub.f32 %v62_v1, %v64_v3  ;;  %v243_v30 = vshrl.u32 %v242_v29, 7  ;;  %v245_v31 = vand.u32 127, %v242_v29  ;;  %s268_s19 = sshll.u32 %s407_s2, 4  ;;  %s269_s19 = int_to_ptr.vmem [resolvable:$true] %s268_s19 }
  0x38   :  { %v66_v6 = vadd.f32 1e-06, %v65_v4  ;;  %s373_s20 = scalar_lea.vmem %s269_s19, 128  ;;  %p378_p11 = scmp.lt.s32.totalorder %s269_s19, %s269_s19 }
  0x39   :  { %v68_v7 = vadd.f32 1e-06, %v67_v5  ;;  %vm246_vm7 = vcmp.eq.s32.totalorder %v243_v30, 0  ;;  %vm247_vm8 = vcmp.eq.s32.totalorder %v245_v31, 0  ;;  %v251_v32 = vsub.s32 0, %v243_v30  ;;  %p374_p10 = scmp.ne.s32.totalorder %s269_s19, %s373_s20  ;;  %p379_p12 = scmp.lt.s32.totalorder %s373_s20, %s373_s20 }
  0x3a   :  { %v69_v8 = vmul.f32 %v66_v6, %v66_v6  ;;  %vm248_vm9 = vmand %vm246_vm7, %vm247_vm8 }
  0x3b   :  { %v147_v9 = vmul.f32 %v68_v7, %v68_v7  ;;  %p380_p13 = por %p379_p12, %p378_p11 }
  0x3c   :  { %287 = vmatpush3.xpose.msk.msra.mxu0 %vm70_vm1, %v69_v8 }
  0x3d   :  { %292 = vmatpush3.xpose.msk.msra.mxu1 %vm70_vm1, %v147_v9  ;;  %p381_p0 = pnand %p380_p13, %p374_p10 }
  0x3f   :  { %289 = vmatmul.mubr.msk.f32.vlgmr.msra.gmra.mrb[0].mxu0 %vm70_vm1, %v406_v10 }
  0x40   :  { %294 = vmatmul.mubr.msk.f32.vlgmr.msra.gmra.mrb[0].mxu1 %vm70_vm1, %v406_v10 }
 0x112   :  { %v143_v11 = vpop.f32.mrb[0].mxu0 }
 0x113   :  { %v217_v12 = vpop.f32.mrb[0].mxu1  ;;  %303 = vrsqrt.f32 %v143_v11  ;;  %v290_v13 = vpop.f32.mrb[1].mxu0  ;;  %vm223_vm2 = vcmp.eq.f32.partialorder %v143_v11, inf  ;;  %v226_v18 = vand.u32 2147483648, %v143_v11  ;;  %vm225_vm3 = vcmp.eq.f32.partialorder %v143_v11, 0.0 }
 0x114   :  { %v295_v14 = vpop.f32.mrb[1].mxu1  ;;  %305 = vrsqrt.f32 %v217_v12  ;;  %vm230_vm4 = vcmp.eq.f32.partialorder %v217_v12, inf  ;;  %v233_v21 = vand.u32 2147483648, %v217_v12  ;;  %vm232_vm5 = vcmp.eq.f32.partialorder %v217_v12, 0.0 }
 0x11d   :  { %v304_v15 = vpop.eup %303 }
 0x11e   :  { %v306_v16 = vpop.eup %305  ;;  %v222_v17 = vmul.f32 %v304_v15, %v143_v11 }
 0x11f   :  { %v229_v19 = vmul.f32 %v306_v16, %v217_v12 }
 0x120   :  { %v224_v20 = vsel %vm223_vm2, %v143_v11, %v222_v17 }
 0x121   :  { %v227_v22 = vsel %vm225_vm3, %v226_v18, %v224_v20  ;;  %v231_v23 = vsel %vm230_vm4, %v217_v12, %v229_v19 }
 0x122   :  { %v234_v24 = vsel %vm232_vm5, %v233_v21, %v231_v23 }
 0x123   :  { %v235_v25 = vsub.f32 %v227_v22, %v234_v24 }
 0x125   :  { %v236_v26 = vadd.f32 1.0, %v235_v25 }
 0x127   :  { %v237_v27 = vmax.f32 %v236_v26, 0.0 }
 0x129   :  { %v239_v28 = vsel %vm238_vm6, %v237_v27, 0.0 }
 0x12a   :  { %240 = vadd.xlane.f32.xlu0 %v239_v28 }
 0x1b7   :  { %v241_v33 = vpop.xlane.xlu0 %240 }
 0x1b8   :  { %v252_v34 = vrot.slane %v241_v33, %v251_v32 }
 0x1ba   :  { %v253_v35 = vsel %vm248_vm9, %v252_v34, 0.0 }
 0x1bb   :  { %261 = vst [vmem:[#allocation8] sm:$0xff] %v253_v35 }
 0x1bc   :  { %384 = shalt.err (!%p381_p0)
}
 0x1bd   :  { %s385_s23 = scalar_lea.hbm %s479_s3, 128 }
 0x1be   :  { %p386_p1 = scmp.ne.s32.totalorder %s479_s3, %s385_s23  ;;  %p389_p2 = scmp.lt.u32.totalorder %s385_s23, %s479_s3 }
 0x1c0   :  { %p391_p3 = pnand %p389_p2, %p386_p1 }
 0x1c2   :  { %394 = shalt.err (!%p391_p3)
}
 0x1c3   :  { %271 = dma.vmem_to_hbm [thread:$0]  %s269_s19, 128, %s479_s3, [#allocation4]  }
 0x1c4   :  { %399 = dma.done.wait [#allocation4], 128  }
 0x1c5   :  { %400 = vsyncadd [#allocation4], 4294967168 }
 0x1c6   :  { %275 = vsyncpa [#allocation3], 1 }
 0x1c7   :  { %276 = vsyncpa [#allocation6], 1 }
 0x1c8   :  { %277 = vsyncpa [#allocation4], 1 }

</bundles_post_ra>
